<compile_context>
chip_gen: v5e
topology: v5e:2x2
jax: 0.10.0
libtpu: 0.0.40
codegen_flags: <defaults>
</compile_context>

<pallas_src>
import functools

import jax
import jax.numpy as jnp
from jax.experimental import pallas as pl
from jax.experimental.pallas import tpu as pltpu

DEFAULT_KERNEL_HEIGHT = 5
STRIDES_DEFAULT = [1, 2, 4]

MXU_DTYPE = jnp.bfloat16        # MXU input dtype; accumulation & bias add stay f32.


# ---------------------------------------------------------------------------
# list helpers (verbatim semantics from the PyTorch module)
# ---------------------------------------------------------------------------
def get_center(strips):
    assert len(strips) % 2 == 1
    return strips[len(strips) // 2]


def get_strip(strips, dir, i):
    assert i >= 0 and (dir == 1 or dir == -1)
    assert len(strips) % 2 == 1
    return strips[len(strips) // 2 + dir * i]


def get_edge_slices_nhwc(dir, pad):
    # NHWC layout: latitude (H) is axis 1.
    if dir == 1:
        return (slice(None), slice(-pad, None), slice(None), slice(None))
    elif dir == -1:
        return (slice(None), slice(None, pad), slice(None), slice(None))
    else:
        assert False


# ---------------------------------------------------------------------------
# earth padding / wrapping helpers (inferred semantics, NHWC layout)
# ---------------------------------------------------------------------------
def earth_pad2d_nhwc(x, padding):
    ph, pw = padding
    if pw > 0:      # circular longitude pad (axis 2)
        x = jnp.concatenate([x[:, :, -pw:, :], x, x[:, :, :pw, :]], axis=2)
    if ph > 0:      # zero latitude pad (axis 1)
        x = jnp.pad(x, ((0, 0), (ph, ph), (0, 0), (0, 0)))
    return x


def earth_wrap2d_nhwc(x, W, n):
    # x width = W + n + r ; shift by n, wrap-add overhangs onto circular width W.
    Wx = x.shape[2]
    out = x[:, :, n:n + W, :]
    if n > 0:
        out = out.at[:, :, W - n:, :].add(x[:, :, :n, :])
    rem = Wx - (n + W)
    if rem > 0:
        out = out.at[:, :, :rem, :].add(x[:, :, n + W:, :])
    return out


# ---------------------------------------------------------------------------
# Pallas kernel: (M, Kc) @ (Kc, Cop) + bias, M tiled with a parallel grid
# ---------------------------------------------------------------------------
def _matmul_bias_kernel(x_ref, w_ref, b_ref, o_ref):
    # x_ref: (tm, Kc) bf16 ; w_ref: (Kc, Cop) bf16 ; b_ref: (1, Cop) f32 ; o_ref: (tm, Cop) f32
    o_ref[...] = (jnp.dot(x_ref[...], w_ref[...], preferred_element_type=jnp.float32)
                  + b_ref[...])


def _round_up(n, m):
    return ((n + m - 1) // m) * m


def _pallas_matmul_bias(x, w, b, cout, compute_dtype=MXU_DTYPE):
    """out = x @ w + b on the MXU.

    x: (M, Kc) any float; w: (Kc, Cop) bf16, Cop already lane-padded to 128;
    b: (1, Cop) f32; cout: static number of valid output channels.  -> (M, cout) f32.
    The contraction dim Kc stays un-padded (block dim == full array dim)."""
    M, Kc = x.shape
    assert w.shape[0] == Kc
    Cop = w.shape[1]
    # M-tile: multiple of 128 for big problems (keeps the MXU full and gives
    # double-buffered DMA/compute overlap across a real grid); one full block for the
    # tiny edge slabs this module typically produces.  Stays well below v7x 64 MiB VMEM.
    if M > 1024:
        tm = 512
    else:
        tm = _round_up(max(M, 8), 8)
    Mp = _round_up(M, tm)

    xp = x.astype(compute_dtype)
    if Mp != M:
        xp = jnp.pad(xp, ((0, Mp - M), (0, 0)))

    itemsize = jnp.dtype(compute_dtype).itemsize
    cost = pl.CostEstimate(
        flops=2 * Mp * Kc * Cop,
        transcendentals=0,
        bytes_accessed=Mp * Kc * itemsize + Kc * Cop * itemsize + Mp * Cop * 4)

    out = pl.pallas_call(
        _matmul_bias_kernel,
        out_shape=jax.ShapeDtypeStruct((Mp, Cop), jnp.float32),
        grid=(Mp // tm,),
        in_specs=[
            pl.BlockSpec((tm, Kc), lambda i: (i, 0)),    # activation tiles (streamed)
            pl.BlockSpec((Kc, Cop), lambda i: (0, 0)),   # weights (resident)
            pl.BlockSpec((1, Cop), lambda i: (0, 0)),    # bias (resident)
        ],
        out_specs=pl.BlockSpec((tm, Cop), lambda i: (i, 0)),   # lane-dense f32 output
        compiler_params=pltpu.CompilerParams(
            dimension_semantics=("parallel",),            # shards M across v7x's 2 TCs
            vmem_limit_bytes=32 * 1024 * 1024,            # explicit; safe on 64 MiB v7x
        ),
        cost_estimate=cost,
    )(xp, w, b)
    return out[:M, :cout]


# ---------------------------------------------------------------------------
# one-time weight packing (torch layouts -> matmul-ready bf16 slabs)
# ---------------------------------------------------------------------------
def _pack_conv_weight(weight, bias):
    """Conv2d weight (Cout, Cin, 1, K) -> (K*Cin, Cop) bf16 + (1, Cop) f32 bias."""
    Cout, Cin, _, K = weight.shape
    wk = jnp.transpose(weight[:, :, 0, :], (2, 1, 0)).reshape(K * Cin, Cout)
    Cop = _round_up(Cout, 128)
    wk = jnp.pad(wk.astype(MXU_DTYPE), ((0, 0), (0, Cop - Cout)))
    bk = jnp.pad(bias.astype(jnp.float32).reshape(1, Cout), ((0, 0), (0, Cop - Cout)))
    return wk, bk


def _pack_convT_weight(weight, stride):
    """ConvTranspose2d weight (Cin, Cout, 1, K) -> polyphase (n_taps*Cin, pad128(s*Cout)) bf16.

    Output phase p (= w mod stride) is a stride-1 conv of x with sub-kernel
    {wt[p + m*stride]}, so the whole transposed conv becomes ONE stride-1 conv with
    ceil(K/stride) taps and stride*Cout output channels — no zero-stuffed dilated
    intermediate and no multiplies by structural zeros."""
    Cin, Cout, _, K = weight.shape
    s = stride
    n_taps = (K - 1) // s + 1                     # taps per phase (3 for K = 2s+1)
    wt = weight[:, :, 0, :]                       # (Cin, Cout, K)
    wpoly = jnp.zeros((n_taps, Cin, s * Cout), dtype=wt.dtype)
    for p in range(s):
        for t in range(n_taps):
            k = p + (n_taps - 1 - t) * s          # tap t of phase p <- kernel index k
            if k < K:
                wpoly = wpoly.at[t, :, p * Cout:(p + 1) * Cout].set(wt[:, :, k])
    CoS = s * Cout
    Cop = _round_up(CoS, 128)
    wk = jnp.pad(wpoly.reshape(n_taps * Cin, CoS).astype(MXU_DTYPE),
                 ((0, 0), (0, Cop - CoS)))
    return wk


def pack_params(params, strip_strides):
    """Fold raw torch-layout params into MXU-ready slabs (call once, outside jit)."""
    inner, outer = [], []
    for li in range(len(strip_strides) - 1):
        r = strip_strides[li + 1] // strip_strides[li]
        outer.append(_pack_conv_weight(params["outer_w"][li], params["outer_b"][li]))
        inner.append(_pack_convT_weight(params["inner_w"][li], r))
    return {"inner": inner, "outer": outer}


# ---------------------------------------------------------------------------
# Width-wise Conv2d / ConvTranspose2d as a single folded MXU matmul (NHWC)
# ---------------------------------------------------------------------------
def conv_width_nhwc(x, wk, bk, K, stride, cout):
    """Conv2d(kernel=(1,K), stride=(1,stride)).  x: (B,H,Win,Cin) NHWC;
    wk: packed (K*Cin, Cop) bf16; bk: (1, Cop) f32."""
    B, H, Win, Cin = x.shape
    Wout = (Win - K) // stride + 1
    # Fold the K taps into the contraction dim -> ONE MXU matmul per call.
    # TODO(synk): for production shapes, extract the taps inside the kernel with
    # strided pl.ds slices instead of this XLA-side im2col (avoids K x HBM read
    # amplification); at these edge-slab sizes the jitted XLA glue fuses it anyway.
    taps = [x[:, :, k:k + stride * (Wout - 1) + 1:stride, :] for k in range(K)]
    xk = jnp.concatenate(taps, axis=-1).reshape(B * H * Wout, K * Cin)
    out = _pallas_matmul_bias(xk, wk, bk, cout)
    return out.reshape(B, H, Wout, cout)


def conv_transpose_width_nhwc(x, wk, K, stride, cout_base):
    """ConvTranspose2d(kernel=(1,K), stride=(1,stride), bias=False), polyphase form.
    x: (B,H,Win,Cin) NHWC; wk: packed (n_taps*Cin, pad128(stride*cout_base)) bf16."""
    B, H, Win, Cin = x.shape
    s = stride
    Wout = (Win - 1) * s + K
    n_taps = (K - 1) // s + 1
    pad_w = n_taps - 1
    xe = jnp.pad(x, ((0, 0), (0, 0), (pad_w, pad_w), (0, 0)))
    Q = xe.shape[2] - n_taps + 1                  # outputs per phase
    taps = [xe[:, :, t:t + Q, :] for t in range(n_taps)]
    xk = jnp.concatenate(taps, axis=-1).reshape(B * H * Q, n_taps * Cin)
    zero_b = jnp.zeros((1, wk.shape[1]), jnp.float32)
    out = _pallas_matmul_bias(xk, wk, zero_b, s * cout_base)
    out = out.reshape(B, H, Q, s, cout_base).reshape(B, H, Q * s, cout_base)
    return out[:, :, :Wout, :]                    # interleave phases, trim overhang


# ---------------------------------------------------------------------------
# HarebrainedPad2d parameters & forward
# ---------------------------------------------------------------------------
def init_params(key, channels, strip_strides):
    inner_w, outer_w, outer_b = [], [], []
    for i in range(1, len(strip_strides)):
        assert strip_strides[i] % strip_strides[i - 1] == 0
        r = strip_strides[i] // strip_strides[i - 1]
        K = 2 * r + 1
        key, k1, k2, k3 = jax.random.split(key, 4)
        scale = 1.0 / jnp.sqrt(float(channels * K))
        outer_w.append(scale * jax.random.normal(k1, (channels, channels, 1, K), jnp.float32))
        outer_b.append(scale * jax.random.normal(k2, (channels,), jnp.float32))
        inner_w.append(scale * jax.random.normal(k3, (channels, channels, 1, K), jnp.float32))
    return {"inner_w": inner_w, "outer_w": outer_w, "outer_b": outer_b}


def harebrained_pad2d_forward(strips, packed, kernel_height=DEFAULT_KERNEL_HEIGHT,
                              strip_strides=STRIDES_DEFAULT):
    N = (len(strip_strides) - 1) * 2 + 1
    assert len(strips) == N, f'strip length mismatch, {len(strips)} vs {N}'
    pad = kernel_height // 2
    ratios = [strip_strides[i] // strip_strides[i - 1] for i in range(1, len(strip_strides))]
    channels = strips[0].shape[1]
    inner_ws = packed["inner"]                     # list of packed bf16 polyphase slabs
    outer_wbs = packed["outer"]                    # list of (packed bf16 w, f32 bias)

    # Channels-last end-to-end: one transpose per strip at entry/exit instead of two
    # transposes around every conv call.
    xs = [jnp.transpose(s, (0, 2, 3, 1)) for s in strips]      # NCHW -> NHWC
    for i in range(1, N // 2 + 1):
        assert get_strip(xs, -1, i).shape == get_strip(xs, 1, i).shape, \
            "symmetric strip widths required for batched edge convs"

    strips_pad = [earth_pad2d_nhwc(x, (pad, pad)) for x in xs]
    cidx = N // 2
    edge = get_edge_slices_nhwc

    # --- center strip: both directions batched into one transposed-conv call ---
    r0 = ratios[0]
    K0 = 2 * r0 + 1
    a_src = jnp.concatenate(
        [get_strip(xs, -1, 1)[edge(+1, pad)],     # dir=-1 reads edge(-dir)=+1
         get_strip(xs, +1, 1)[edge(-1, pad)]], axis=0)
    a = conv_transpose_width_nhwc(a_src, inner_ws[0], K0, r0, channels)
    a = earth_wrap2d_nhwc(a, get_center(xs).shape[2], K0 // 2)
    a = earth_pad2d_nhwc(a, (0, pad))
    a_neg, a_pos = jnp.split(a, 2, axis=0)
    c = strips_pad[cidx]
    c = c.at[edge(-1, pad)].set(a_neg)            # dir=-1 writes edge(dir)=-1
    c = c.at[edge(+1, pad)].set(a_pos)
    strips_pad[cidx] = c

    # --- other strips: both directions batched per (mi, conv kind) ---
    for mi in range(1, N // 2 + 1):
        if mi + 1 <= N // 2:
            ri = ratios[mi]
            Ki = 2 * ri + 1
            o_src = jnp.concatenate(
                [get_strip(xs, -1, mi + 1)[edge(+1, pad)],
                 get_strip(xs, +1, mi + 1)[edge(-1, pad)]], axis=0)
            o = conv_transpose_width_nhwc(o_src, inner_ws[mi], Ki, ri, channels)
            o = earth_wrap2d_nhwc(o, get_strip(xs, -1, mi).shape[2], Ki // 2)
            o = earth_pad2d_nhwc(o, (0, pad))
            o_neg, o_pos = jnp.split(o, 2, axis=0)
            strips_pad[cidx - mi] = strips_pad[cidx - mi].at[edge(-1, pad)].set(o_neg)
            strips_pad[cidx + mi] = strips_pad[cidx + mi].at[edge(+1, pad)].set(o_pos)
        ro = ratios[mi - 1]
        Ko = 2 * ro + 1
        en_src = jnp.concatenate(
            [get_strip(xs, -1, mi - 1)[edge(-1, pad)],   # dir=-1 reads edge(dir)=-1
             get_strip(xs, +1, mi - 1)[edge(+1, pad)]], axis=0)
        en = earth_pad2d_nhwc(en_src, (0, Ko // 2))
        wk, bk = outer_wbs[mi - 1]
        en = conv_width_nhwc(en, wk, bk, Ko, ro, channels)
        en = earth_pad2d_nhwc(en, (0, pad))
        en_neg, en_pos = jnp.split(en, 2, axis=0)
        strips_pad[cidx - mi] = strips_pad[cidx - mi].at[edge(+1, pad)].set(en_neg)
        strips_pad[cidx + mi] = strips_pad[cidx + mi].at[edge(-1, pad)].set(en_pos)

    # back to the module's NCHW output layout
    return [jnp.transpose(s, (0, 3, 1, 2)) for s in strips_pad]


# ---------------------------------------------------------------------------
if __name__ == "__main__":
    key = jax.random.PRNGKey(0)
    channels = 4
    strip_strides = [1, 2, 4]
    kernel_height = 5
    B, H, W = 2, 8, 16
    n_strips = 5
    widths = [W // strip_strides[abs(i - n_strips // 2)] for i in range(n_strips)]  # [4,8,16,8,4]

    keys = jax.random.split(key, n_strips + 3)
    strips = [jax.random.normal(keys[i], (B, channels, H, widths[i]), jnp.float32)
              for i in range(n_strips)]
    params = init_params(keys[n_strips], channels, strip_strides)
    packed = pack_params(params, strip_strides)            # one-time weight folding

    # --- sanity check the Pallas conv primitives against XLA convolutions (NHWC) ---
    xt = jax.random.normal(keys[n_strips + 1], (B, 2, 8, channels), jnp.float32)
    w, b = params["outer_w"][0], params["outer_b"][0]
    wk0, bk0 = packed["outer"][0]
    got = conv_width_nhwc(xt, wk0, bk0, K=5, stride=2, cout=channels)
    ref = jax.lax.conv_general_dilated(
        xt, jnp.transpose(w, (2, 3, 1, 0)), (1, 2), 'VALID',
        dimension_numbers=('NHWC', 'HWIO', 'NHWC'),
        precision=jax.lax.Precision.HIGHEST) + b.reshape(1, 1, 1, -1)
    assert bool(jnp.allclose(got, ref, atol=5e-2, rtol=5e-2)), "conv_width mismatch"

    wi = params["inner_w"][0]
    K = wi.shape[3]
    got_t = conv_transpose_width_nhwc(xt, packed["inner"][0], K=K, stride=2,
                                      cout_base=channels)
    ref_t = jax.lax.conv_general_dilated(
        xt, jnp.transpose(jnp.flip(wi, axis=3), (2, 3, 0, 1)),
        (1, 1), ((0, 0), (K - 1, K - 1)), lhs_dilation=(1, 2),
        dimension_numbers=('NHWC', 'HWIO', 'NHWC'),
        precision=jax.lax.Precision.HIGHEST)
    assert bool(jnp.allclose(got_t, ref_t, atol=5e-2, rtol=5e-2)), "conv_transpose_width mismatch"

    # --- full forward (jitted so the pad/slice/concat glue fuses around the kernels) ---
    fwd = jax.jit(functools.partial(harebrained_pad2d_forward,
                                    kernel_height=kernel_height,
                                    strip_strides=strip_strides))
    out = fwd(strips, packed)
    out = [jax.block_until_ready(o) for o in out]

    pad = kernel_height // 2
    for o, wdt in zip(out, widths):
        assert o.shape == (B, channels, H + 2 * pad, wdt + 2 * pad), o.shape

    print("KERNEL_OK")
</pallas_src>

<mosaic_0001>
module attributes {stable_mosaic.version = 11 : i64} {
  func.func @_matmul_bias_kernel(%arg0: i32, %arg1: memref<8x20xbf16, #tpu.memory_space<vmem>>, %arg2: memref<20x128xbf16, #tpu.memory_space<vmem>>, %arg3: memref<1x128xf32, #tpu.memory_space<vmem>>, %arg4: memref<8x128xf32, #tpu.memory_space<vmem>>) attributes {dimension_semantics = [#tpu.dimension_semantics<parallel>], iteration_bounds = array<i64: 1>, scalar_prefetch = 0 : i64, scratch_operands = 0 : i64, tpu.core_type = #tpu.core_type<tc>, window_params = [{transform_indices = @transform_0, window_bounds = array<i64: 8, 20>}, {pipeline_mode = #tpu.pipeline_mode<synchronous>, transform_indices = @transform_1, window_bounds = array<i64: 20, 128>}, {pipeline_mode = #tpu.pipeline_mode<synchronous>, transform_indices = @transform_2, window_bounds = array<i64: 1, 128>}, {transform_indices = @transform_3, window_bounds = array<i64: 8, 128>}]} {
    %c0 = arith.constant 0 : index
    %c0_0 = arith.constant 0 : index
    %0 = vector.load %arg1[%c0, %c0_0] : memref<8x20xbf16, #tpu.memory_space<vmem>>, vector<8x20xbf16>
    %c0_1 = arith.constant 0 : index
    %c0_2 = arith.constant 0 : index
    %1 = vector.load %arg2[%c0_1, %c0_2] : memref<20x128xbf16, #tpu.memory_space<vmem>>, vector<20x128xbf16>
    %cst = arith.constant dense<0.000000e+00> : vector<8x128xf32>
    %2 = tpu.matmul %0, %1, %cst {dimension_numbers = #tpu.dot_dimension_numbers<[1], [0], [0], [1], [0, 0, 1, 1], [], []>} : vector<8x20xbf16>, vector<20x128xbf16>, vector<8x128xf32> -> vector<8x128xf32>
    %c0_3 = arith.constant 0 : index
    %c0_4 = arith.constant 0 : index
    %3 = vector.load %arg3[%c0_3, %c0_4] : memref<1x128xf32, #tpu.memory_space<vmem>>, vector<1x128xf32>
    %4 = vector.broadcast %3 : vector<1x128xf32> to vector<8x128xf32>
    %5 = arith.addf %2, %4 : vector<8x128xf32>
    %c0_5 = arith.constant 0 : index
    %c0_6 = arith.constant 0 : index
    %6 = vector.load %arg4[%c0_5, %c0_6] : memref<8x128xf32, #tpu.memory_space<vmem>>, vector<8x128xf32>
    tpu.vector_store %arg4[%c0_5, %c0_6], %5 {strides = array<i32>} : memref<8x128xf32, #tpu.memory_space<vmem>>, vector<8x128xf32>,
    return
  }
  func.func @transform_0(%arg0: i32) -> (i32, i32) {
    %c0_i32 = arith.constant 0 : i32
    %c0_i32_0 = arith.constant 0 : i32
    return %arg0, %c0_i32 : i32, i32
  }
  func.func @transform_1(%arg0: i32) -> (i32, i32) {
    %c0_i32 = arith.constant 0 : i32
    %c0_i32_0 = arith.constant 0 : i32
    %c0_i32_1 = arith.constant 0 : i32
    return %c0_i32, %c0_i32_0 : i32, i32
  }
  func.func @transform_2(%arg0: i32) -> (i32, i32) {
    %c0_i32 = arith.constant 0 : i32
    %c0_i32_0 = arith.constant 0 : i32
    %c0_i32_1 = arith.constant 0 : i32
    return %c0_i32, %c0_i32_0 : i32, i32
  }
  func.func @transform_3(%arg0: i32) -> (i32, i32) {
    %c0_i32 = arith.constant 0 : i32
    %c0_i32_0 = arith.constant 0 : i32
    return %arg0, %c0_i32 : i32, i32
  }
}

</mosaic_0001>

<bundles_post_ra>
// kernel: tpu_custom_call.1
= control target key start
LH: loop header
LB: loop body
LE: loop exit
PB: predicated region body
PF: predicated region fallthrough
CT: control target
= control target key end

     0   :  { %8 = vsyncpa [#allocation3], 0  ;;  %s230_s0 = inlined_call_operand.hbm [shape: bf16[8,20], index: 0, kind: input, shape index: {}]   ;;  %s231_s1 = inlined_call_operand.hbm [shape: bf16[20,128], index: 1, kind: input, shape index: {}]   ;;  %s232_s2 = inlined_call_operand.vmem [shape: f32[1,128], index: 2, kind: input, shape index: {}]   ;;  %s233_s3 = inlined_call_operand.hbm [shape: f32[8,128], index: 3, kind: output, shape index: {}]  }
   0x1   :  { %9 = vsyncpa [#allocation6], 0 }
   0x2   :  { %10 = vsyncpa [#allocation4], 0  ;;  %s16_s14 = sshll.u32 %s230_s0, 4  ;;  %s193_s15 = smov [#allocation2]   ;;  %s17_s14 = int_to_ptr.hbm [resolvable:$true] %s16_s14 }
   0x3   :  { %s18_s16 = sshll.u32 %s193_s15, 4  ;;  %s26_s19 = sshll.u32 %s231_s1, 4  ;;  %s19_s16 = int_to_ptr.vmem [resolvable:$true] %s18_s16  ;;  %s27_s19 = int_to_ptr.hbm [resolvable:$true] %s26_s19 }
   0x4   :  { %21 = dma.hbm_to_vmem [thread:$0]  %s17_s14, 64, %s19_s16, [#allocation3]  }
   0x5   :  { %s194_s20 = smov [#allocation5]   ;;  %s195_s22 = smov 64  }
   0x6   :  { %s28_s21 = sshll.u32 %s194_s20, 4  ;;  %s196_s23 = smov 4   ;;  %s29_s21 = int_to_ptr.vmem [resolvable:$true] %s28_s21 }
   0x7   :  { %34 = dma.hbm_to_vmem [thread:$0]  %s27_s19, 192, %s29_s21, [#allocation6], %s195_s22, %s195_s22, %s196_s23  }
   0x8   :  { %187 = dma.done.wait [#allocation3], 64  }
   0x9   :  { %188 = vsyncadd [#allocation3], 4294967232 }
   0xa   :  { %189 = dma.done.wait [#allocation6], 192  }
   0xb   :  { %190 = vsyncadd [#allocation6], 4294967104  ;;  %v49_v0 = vld [vmem:[#allocation5 + $0x8] sm:$0x3]  ;;  %vm67_vm0 = vcmask 1041408   ;;  %v108_v4 = vld [vmem:[#allocation5] sm:$0xff] }
   0xc   :  { %v59_v1 = vunpack.c.l.b16 %v49_v0  ;;  %v46_v5 = vld [vmem:[#allocation2] sm:$0xf]  ;;  %vm63_vm1 = vcmask 162816   ;;  %s197_s24 = smov [#allocation7]   ;;  %s92_s28 = sshll.u32 %s233_s3, 4  ;;  %s93_s28 = int_to_ptr.hbm [resolvable:$true] %s92_s28 }
   0xd   :  { %v114_v6 = vld [vmem:[%s232_s2] ss:$0 sm:$0xff]  ;;  %s90_s25 = sshll.u32 %s197_s24, 4  ;;  %s91_s25 = int_to_ptr.vmem [resolvable:$true] %s90_s25 }
   0xe   :  { %v61_v2 = vpack.c.b16 %v59_v1, %v59_v1 }
  0x10   :  { %v69_v3 = vsel %vm67_vm0, %v61_v2, 0 }
  0x11   :  { %77 = vmatpush.bf16.msra.mxu0 %v69_v3 }
  0x15   :  { %78 = vmatpush.bf16.msra.mxu0 %v108_v4 }
  0x18   :  { %107 = vmatmul.msk.bf16.vlgmr.msra.gmra.mxu0 %vm63_vm1, %v46_v5 }
  0x95   :  { %v80_v7 = vpop.f32.mrf.mxu0 }
  0x96   :  { %v81_v8 = vadd.f32 %v114_v6, %v80_v7 }
  0x98   :  { %84 = vst [vmem:[#allocation7] sm:$0xff] %v81_v8 }
  0x99   :  { %95 = dma.vmem_to_hbm [thread:$0]  %s91_s25, 128, %s93_s28, [#allocation4]  }
  0x9d   :  { %v82_v9 = vpop.f32.mrf.mxu0 }
  0x9e   :  { %191 = dma.done.wait [#allocation4], 128  }
  0x9f   :  { %192 = vsyncadd [#allocation4], 4294967168 }
  0xa0   :  { %100 = vsyncpa [#allocation3], 1 }
  0xa1   :  { %101 = vsyncpa [#allocation6], 1 }
  0xa2   :  { %102 = vsyncpa [#allocation4], 1 }

</bundles_post_ra>
